<compile_context>
chip_gen: v7x
topology: tpu7x:2x2x1
jax: 0.10.0
libtpu: 0.0.40
codegen_flags: <defaults>
</compile_context>

<pallas_src>
import functools
import math

import jax
import jax.numpy as jnp
from jax.experimental import pallas as pl
from jax.experimental.pallas import tpu as pltpu


def layer_norm_kernel(eps, x_ref, gb_ref, out_ref):
    """One grid step normalizes a (tile_rows, D) slab of rows over the last dim."""
    x = x_ref[...].astype(jnp.float32)    # upcast for stats; I/O stays native dtype
    gamma = gb_ref[0:1, :]                # (1, D) f32, resident
    beta = gb_ref[1:2, :]                 # (1, D) f32, resident
    d = x.shape[-1]

    # Two-pass centered statistics (x already in VMEM/vregs -> second pass is
    # one extra XLU reduce + VPU subtract, hidden under the HBM roofline).
    mean = jnp.sum(x, axis=-1, keepdims=True) * (1.0 / d)          # (TR, 1)
    xc = x - mean
    var = jnp.sum(xc * xc, axis=-1, keepdims=True) * (1.0 / (d - 1))  # unbiased
    std = jnp.sqrt(var)
    inv = 1.0 / (std + eps)               # one divide per row

    out_ref[...] = (xc * inv * gamma + beta).astype(out_ref.dtype)


def _round_up(x, m):
    return (x + m - 1) // m * m


def _choose_tile_rows(n_rows, d, itemsize, *, bytes_budget=6 << 20, target_steps=8):
    """Row-tile size: biggest multiple-of-8 tile under the VMEM budget, but
    capped so the 1-D parallel grid keeps >= target_steps steps when the row
    count allows it (megacore / v7x dual-TC sharding)."""
    cap = max(8, (bytes_budget // (itemsize * d)) // 8 * 8)
    parallel_cap = max(8, _round_up(pl.cdiv(n_rows, target_steps), 8))
    return max(8, min(cap, parallel_cap, _round_up(n_rows, 8)))


def layer_norm(x, gamma, beta, *, eps=1e-6):
    """LayerNorm (unbiased std, eps on std) over the last axis of x."""
    orig_shape = x.shape
    d = orig_shape[-1]
    if d < 2:
        # torch.Tensor.std over a single element is NaN (N-1 == 0); guard.
        raise ValueError("layer_norm requires features >= 2 (unbiased std).")
    n = math.prod(orig_shape[:-1]) if len(orig_shape) > 1 else 1

    x2 = x.reshape(n, d)                                # metadata-only reshape
    itemsize = jnp.dtype(x2.dtype).itemsize
    tr = _choose_tile_rows(n, d, itemsize)
    grid = (pl.cdiv(n, tr),)                            # ragged last block OK

    # Pack gamma/beta into one small resident f32 block (single constant-index DMA).
    gb = jnp.stack(
        [jnp.asarray(gamma, jnp.float32).reshape(d),
         jnp.asarray(beta, jnp.float32).reshape(d)],
        axis=0)

    out = pl.pallas_call(
        functools.partial(layer_norm_kernel, float(eps)),
        out_shape=jax.ShapeDtypeStruct((n, d), x2.dtype),   # native-dtype output
        grid=grid,
        in_specs=[
            pl.BlockSpec((tr, d), lambda i: (i, 0)),   # row tile of x (native dtype)
            pl.BlockSpec((2, d), lambda i: (0, 0)),    # packed gamma/beta, resident
        ],
        out_specs=pl.BlockSpec((tr, d), lambda i: (i, 0)),
        compiler_params=pltpu.CompilerParams(
            dimension_semantics=("parallel",),
            vmem_limit_bytes=40 << 20,   # 2 in + 2 out buffers of ~6 MiB + gb, all gens
        ),
    )(x2, gb)

    return out.reshape(orig_shape)


def reference_layer_norm(x, gamma, beta, *, eps=1e-6):
    """Pure-JAX reference matching the PyTorch forward exactly (f32)."""
    x = x.astype(jnp.float32)
    mean = jnp.mean(x, axis=-1, keepdims=True)
    var = jnp.sum((x - mean) ** 2, axis=-1, keepdims=True) / (x.shape[-1] - 1)
    std = jnp.sqrt(var)
    return gamma * (x - mean) / (std + eps) + beta


if __name__ == "__main__":
    key = jax.random.PRNGKey(0)
    kx, kg, kb, kx2, kx3 = jax.random.split(key, 5)

    # Small transformer-like shapes: (batch=2, seq=8, features=32).
    B, L, D = 2, 8, 32
    x = jax.random.normal(kx, (B, L, D), jnp.float32)
    gamma = 1.0 + 0.1 * jax.random.normal(kg, (D,), jnp.float32)
    beta = 0.1 * jax.random.normal(kb, (D,), jnp.float32)

    # f32 path.
    out = jax.block_until_ready(layer_norm(x, gamma, beta, eps=1e-6))
    ref = reference_layer_norm(x, gamma, beta, eps=1e-6)
    assert out.shape == x.shape and out.dtype == x.dtype
    assert jnp.allclose(out, ref, atol=1e-5, rtol=1e-5), (
        f"f32 max abs diff {jnp.max(jnp.abs(out - ref))}")

    # Row count not a multiple of the tile -> exercises ragged-block masked writeback.
    x_odd = jax.random.normal(kx2, (3, 5, D), jnp.float32)
    out_odd = jax.block_until_ready(layer_norm(x_odd, gamma, beta, eps=1e-6))
    ref_odd = reference_layer_norm(x_odd, gamma, beta, eps=1e-6)
    assert jnp.allclose(out_odd, ref_odd, atol=1e-5, rtol=1e-5), (
        f"odd-rows max abs diff {jnp.max(jnp.abs(out_odd - ref_odd))}")

    # Native bf16 I/O path (stats still in f32 inside the kernel).
    x_bf16 = jax.random.normal(kx3, (B, L, D), jnp.float32).astype(jnp.bfloat16)
    out_bf16 = jax.block_until_ready(layer_norm(x_bf16, gamma, beta, eps=1e-6))
    ref_bf16 = reference_layer_norm(x_bf16, gamma, beta, eps=1e-6)
    assert out_bf16.dtype == jnp.bfloat16
    assert jnp.allclose(out_bf16.astype(jnp.float32), ref_bf16,
                        atol=2e-2, rtol=2e-2), (
        f"bf16 max abs diff "
        f"{jnp.max(jnp.abs(out_bf16.astype(jnp.float32) - ref_bf16))}")

    print("KERNEL_OK")
</pallas_src>

<mosaic_0001>
module attributes {stable_mosaic.version = 11 : i64} {
  func.func @layer_norm_kernel(%arg0: i32, %arg1: memref<8x32xf32, #tpu.memory_space<vmem>>, %arg2: memref<2x32xf32, #tpu.memory_space<vmem>>, %arg3: memref<8x32xf32, #tpu.memory_space<vmem>>) attributes {dimension_semantics = [#tpu.dimension_semantics<parallel>], iteration_bounds = array<i64: 2>, scalar_prefetch = 0 : i64, scratch_operands = 0 : i64, tpu.core_type = #tpu.core_type<tc>, window_params = [{transform_indices = @transform_0, window_bounds = array<i64: 8, 32>}, {pipeline_mode = #tpu.pipeline_mode<synchronous>, transform_indices = @transform_1, window_bounds = array<i64: 2, 32>}, {transform_indices = @transform_2, window_bounds = array<i64: 8, 32>}]} {
    %c0 = arith.constant 0 : index
    %c0_0 = arith.constant 0 : index
    %0 = vector.load %arg1[%c0, %c0_0] : memref<8x32xf32, #tpu.memory_space<vmem>>, vector<8x32xf32>
    %c0_1 = arith.constant 0 : index
    %c0_2 = arith.constant 0 : index
    %1 = vector.load %arg2[%c0_1, %c0_2] : memref<2x32xf32, #tpu.memory_space<vmem>>, vector<1x32xf32>
    %c1 = arith.constant 1 : index
    %c0_3 = arith.constant 0 : index
    %2 = vector.load %arg2[%c1, %c0_3] : memref<2x32xf32, #tpu.memory_space<vmem>>, vector<1x32xf32>
    %cst = arith.constant dense<0.000000e+00> : vector<8xf32>
    %3 = vector.multi_reduction <add>, %0, %cst [1] : vector<8x32xf32> to vector<8xf32>
    %4 = vector.shape_cast %3 : vector<8xf32> to vector<8x1xf32>
    %cst_4 = arith.constant 3.125000e-02 : f32
    %5 = vector.broadcast %cst_4 : f32 to vector<8x1xf32>
    %6 = arith.mulf %4, %5 : vector<8x1xf32>
    %7 = vector.broadcast %6 : vector<8x1xf32> to vector<8x32xf32>
    %8 = arith.subf %0, %7 : vector<8x32xf32>
    %9 = arith.mulf %8, %8 : vector<8x32xf32>
    %cst_5 = arith.constant dense<0.000000e+00> : vector<8xf32>
    %10 = vector.multi_reduction <add>, %9, %cst_5 [1] : vector<8x32xf32> to vector<8xf32>
    %11 = vector.shape_cast %10 : vector<8xf32> to vector<8x1xf32>
    %cst_6 = arith.constant 0.0322580636 : f32
    %12 = vector.broadcast %cst_6 : f32 to vector<8x1xf32>
    %13 = arith.mulf %11, %12 : vector<8x1xf32>
    %14 = math.sqrt %13 : vector<8x1xf32>
    %cst_7 = arith.constant 9.99999997E-7 : f32
    %15 = vector.broadcast %cst_7 : f32 to vector<8x1xf32>
    %16 = arith.addf %14, %15 : vector<8x1xf32>
    %cst_8 = arith.constant 1.000000e+00 : f32
    %17 = vector.broadcast %cst_8 : f32 to vector<8x1xf32>
    %18 = arith.divf %17, %16 : vector<8x1xf32>
    %19 = vector.broadcast %18 : vector<8x1xf32> to vector<8x32xf32>
    %20 = arith.mulf %8, %19 : vector<8x32xf32>
    %21 = vector.broadcast %1 : vector<1x32xf32> to vector<8x32xf32>
    %22 = arith.mulf %20, %21 : vector<8x32xf32>
    %23 = vector.broadcast %2 : vector<1x32xf32> to vector<8x32xf32>
    %24 = arith.addf %22, %23 : vector<8x32xf32>
    %c0_9 = arith.constant 0 : index
    %c0_10 = arith.constant 0 : index
    %25 = vector.load %arg3[%c0_9, %c0_10] : memref<8x32xf32, #tpu.memory_space<vmem>>, vector<8x32xf32>
    tpu.vector_store %arg3[%c0_9, %c0_10], %24 {strides = array<i32>} : memref<8x32xf32, #tpu.memory_space<vmem>>, vector<8x32xf32>,
    return
  }
  func.func @transform_0(%arg0: i32) -> (i32, i32) {
    %c0_i32 = arith.constant 0 : i32
    %c0_i32_0 = arith.constant 0 : i32
    return %arg0, %c0_i32 : i32, i32
  }
  func.func @transform_1(%arg0: i32) -> (i32, i32) {
    %c0_i32 = arith.constant 0 : i32
    %c0_i32_0 = arith.constant 0 : i32
    %c0_i32_1 = arith.constant 0 : i32
    return %c0_i32, %c0_i32_0 : i32, i32
  }
  func.func @transform_2(%arg0: i32) -> (i32, i32) {
    %c0_i32 = arith.constant 0 : i32
    %c0_i32_0 = arith.constant 0 : i32
    return %arg0, %c0_i32 : i32, i32
  }
}

</mosaic_0001>

<bundles_post_ra>
// kernel: tpu_custom_call.1
= control target key start
LH: loop header
LB: loop body
LE: loop exit
PB: predicated region body
PF: predicated region fallthrough
CT: control target
= control target key end

     0   :  { %7 = vsyncpa [#allocation3], 0  ;;  %s632_s0 = inlined_call_operand.hbm [shape: f32[16,32], index: 0, kind: input, shape index: {}]   ;;  %s633_s1 = inlined_call_operand.vmem [shape: f32[2,32], index: 1, kind: input, shape index: {}]   ;;  %s634_s2 = inlined_call_operand.hbm [shape: f32[16,32], index: 2, kind: output, shape index: {}]  }
   0x1   :  { %9 = vsyncpa [#allocation3 + $0x1], 0 }
   0x2   :  { %10 = vsyncpa [#allocation4], 0 }
   0x3   :  { %12 = vsyncpa [#allocation4 + $0x1], 0  ;;  %s458_s9 = smov 0   ;;  %s460_s10 = smov 0  }
   0x4   :  { %s462_s11 = smov 0   ;;  %s464_s12 = smov 0  }
   0x5 LB: > { %s479_s13 = sadd.s32 4294967295, %s439_s12   ;;  %s279_s14 = sadd.s32 4294967294, %s439_s12   ;;  %s439_s12 = sphi %s464_s12, %s649_s12   ;;  %s435_s11 = sphi %s462_s11, %s648_s11   ;;  %s431_s10 = sphi %s460_s10, %s647_s10   ;;  %s427_s9 = sphi %s458_s9, %s646_s9  }
   0x6   : > { %s483_s15 = sadd.s32 1, %s439_s12   ;;  %s25_s16 = sadd.s32 1, %s435_s11 }
   0x7   : > { %s22_s17 = ssub.s32 %s439_s12, %s483_s15  ;;  %p32_p0 = scmp.ne.s32.totalorder %s435_s11, %s431_s10 }
   0x8   : > { %p23_p1 = scmp.eq.s32.totalorder %s22_s17, 0  ;;  %p33_p2 = scmp.eq.s32.totalorder %s439_s12, 0 }
   0x9   : > { %p38_p3 = scmp.ne.s32.totalorder %s431_s10, %s427_s9  ;;  %p39_p4 = scmp.eq.s32.totalorder %s479_s13, 0 }
   0xa   : > { %s495_s18 = scalar_select %p23_p1, %s435_s11, %s25_s16  }
   0xb   : > { %p497_p5 = por %p33_p2, %p32_p0  ;;  %p501_p6 = por %p39_p4, %p38_p3 }
   0xc   : > { %p83_p7 = scmp.eq.s32.totalorder %s479_s13, 1  ;;  %p89_p8 = scmp.eq.s32.totalorder %s279_s14, 1 }
   0xd   : > { %p305_p10 = scmp.lt.s32.totalorder %s439_s12, 2  ;;  %s112_s23 = sand.u32 1, %s435_s11  }
   0xe   : > { %p508_p11 = por %p83_p7, %p32_p0  ;;  %p512_p12 = por %p89_p8, %p38_p3 }
   0xf   : > { %s283_s24 = sshll.u32 %s439_s12, 7  ;;  %s282_s25 = sshll.u32 %s112_s23, 3 }
  0x10   : > { %s638_s21 = scalar_select %p508_p11, 1, 0 }
  0x11   : > { %s639_s22 = scalar_select %p512_p12, 1, 0 }
  0x12   : > { %s521_s28 = scalar_lea.hbm %s632_s0, %s283_s24  ;;  %s116_s29 = scalar_lea.vmem [#allocation2], %s282_s25 }
  0x13   : > { %s123_s30 = sshll.u32 %s116_s29, 4  ;;  %p525_p13 = pnand %p305_p10, %p497_p5  ;;  %s529_s30 = int_to_ptr.vmem [resolvable:$true] %s123_s30 }
  0x14   : > { %s113_s4 = scalar_lea.sflag [#allocation3], %s112_s23  ;;  %s343_s5 = scalar_lea.hbm %s521_s28, 128 }
  0x15   : > { %p344_p2 = scmp.ne.s32.totalorder %s521_s28, %s343_s5  ;;  %p345_p3 = pneg %p525_p13 }
  0x16   : > { %s348_s8 = scalar_lea.hbm %s632_s0, 256  ;;  %p349_p5 = scmp.lt.u32.totalorder %s521_s28, %s632_s0 }
  0x17   : > { %p346_p4 = pnand %p345_p3, %p344_p2  ;;  %p350_p8 = scmp.lt.u32.totalorder %s348_s8, %s343_s5 }
  0x18   : > { %p352_p9 = scmp.lt.u32.totalorder %s343_s5, %s521_s28 }
  0x19   : > { %p347_p7 = pneg %p346_p4  ;;  %p351_p10 = por %p350_p8, %p349_p5 }
  0x1b   : > { %p353_p0 = por %p352_p9, %p351_p10 }
  0x1d   : > { %p354_p1 = pnand %p353_p0, %p347_p7 }
  0x1f   : > { %357 = shalt.err (!%p354_p1)
}
  0x20   : > { %s358_s17 = scalar_lea.vmem %s529_s30, 128  ;;  %s441_s19 = smov [#allocation2]  }
  0x21   : > { %p359_p2 = scmp.ne.s32.totalorder %s529_s30, %s358_s17  ;;  %s363_s23 = sshll.u32 %s441_s19, 4  ;;  %s364_s23 = int_to_ptr.vmem [resolvable:$false] %s363_s23 }
  0x22   : > { %s365_s24 = scalar_lea.vmem %s364_s23, 256  ;;  %p366_p11 = scmp.lt.s32.totalorder %s529_s30, %s364_s23 }
  0x23   : > { %p361_p4 = pnand %p359_p2, %p345_p3  ;;  %p367_p5 = scmp.lt.s32.totalorder %s365_s24, %s358_s17 }
  0x25   : > { %p362_p12 = pneg %p361_p4  ;;  %p368_p8 = por %p367_p5, %p366_p11 }
  0x27   : > { %p369_p9 = pnand %p368_p8, %p362_p12 }
  0x29   : > { %372 = shalt.err (!%p369_p9)
}
  0x2a   : > { %300 = dma.hbm_to_vmem [thread:$0]  (!%p525_p13), %s521_s28, 128, %s529_s30, %s113_s4  }
  0x2b   : > { %p641_p0 = scmp.lt.s32.totalorder %s439_s12, 3  ;;  %p642_p1 = scmp.ge.s32.totalorder %s439_s12, 1 }
  0x2d   : > { %p129_p3 = pnand %p642_p1, %p641_p0 }
  0x2e   : > { %s563_s25 = sand.u32 (!%p129_p3), 1, %s431_s10  }
  0x2f   : > { %132 = sbr.rel (%p129_p3) target bundleno = 398 (0x18e), region = 28  ;;  %s285_s26 = sshll.u32 (!%p129_p3), %s563_s25, 3 }
  0x30   : > { %s135_s27 = scalar_lea.sflag (!%p129_p3), [#allocation3], %s563_s25  ;;  %s138_s29 = scalar_lea.vmem (!%p129_p3), [#allocation2], %s285_s26 }
  0x36   : > { %418 = dma.done.wait (%p501_p6), %s135_s27, 128  }
  0x37   : > { %420 = vsyncadd (%p501_p6), %s135_s27, 4294967168  ;;  %vm162_vm0 = vcmask 261120   ;;  %v159_v0 = vld [vmem:[%s138_s29] sm:$0xff]  ;;  %s290_s4 = sshll.u32 %s479_s13, 7  ;;  %s158_s5 = scalar_lea.vmem [#allocation5], %s285_s26 }
  0x38   : > { %v163_v1 = vsel %vm162_vm0, %v159_v0, 0.0  ;;  %v287_v16 = vld [vmem:[%s633_s1] ss:$0 sm:$0xff]  ;;  %v288_v18 = vld [vmem:[%s633_s1 + $0x1] ss:$0 sm:$0xff]  ;;  %s209_s6 = sshll.u32 %s158_s5, 4  ;;  %s587_s14 = scalar_lea.hbm %s634_s2, %s290_s4  ;;  %s589_s6 = int_to_ptr.vmem [resolvable:$true] %s209_s6 }
  0x39   : > { %164 = vadd.xlane.f32.xlu0 %v163_v1  ;;  %s196_s16 = scalar_lea.sflag [#allocation4], %s563_s25  ;;  %s373_s17 = scalar_lea.vmem %s589_s6, 128 }
  0x3a   : > { %p374_p6 = scmp.ne.s32.totalorder %s589_s6, %s373_s17  ;;  %p643_p11 = scmp.ne.s32.totalorder %s638_s21, 0 }
  0x3b   : > { %s442_s13 = smov [#allocation5]  }
  0x3c   : > { %p375_p12 = pnand %p374_p6, %p643_p11  ;;  %s377_s19 = sshll.u32 %s442_s13, 4  ;;  %s378_s19 = int_to_ptr.vmem [resolvable:$false] %s377_s19 }
  0x3d   : > { %s379_s23 = scalar_lea.vmem %s378_s19, 256  ;;  %p380_p7 = scmp.lt.s32.totalorder %s589_s6, %s378_s19 }
  0x3e   : > { %p376_p13 = pneg %p375_p12  ;;  %p381_p10 = scmp.lt.s32.totalorder %s379_s23, %s373_s17 }
  0x40   : > { %p382_p2 = por %p381_p10, %p380_p7 }
  0x42   : > { %p383_p4 = pnand %p382_p2, %p376_p13 }
  0xc6   : > { %v165_v2 = vpop.xlane.xlu0 %164 }
  0xc7   : > { %v166_v3 = vmul.f32 0.03125, %v165_v2 }
  0xc9   : > { %v167_v4 = vsub.f32 %v159_v0, %v166_v3 }
  0xcb   : > { %v168_v5 = vmul.f32 %v167_v4, %v167_v4 }
  0xcd   : > { %v169_v6 = vsel %vm162_vm0, %v168_v5, 0.0 }
  0xce   : > { %170 = vadd.xlane.f32.xlu0 %v169_v6 }
 0x15b   : > { %v171_v7 = vpop.xlane.xlu0 %170 }
 0x15c   : > { %v172_v8 = vmul.f32 0.032258064, %v171_v7 }
 0x15e   : > { %339 = vrsqrt.f32 %v172_v8  ;;  %vm175_vm1 = vcmp.eq.f32.partialorder %v172_v8, inf  ;;  %v178_v11 = vand.u32 2147483648, %v172_v8  ;;  %vm177_vm2 = vcmp.eq.f32.partialorder %v172_v8, 0.0 }
 0x168   : > { %v340_v9 = vpop.eup %339 }
 0x169   : > { %v174_v10 = vmul.f32 %v340_v9, %v172_v8 }
 0x16b   : > { %v176_v12 = vsel %vm175_vm1, %v172_v8, %v174_v10 }
 0x16c   : > { %v179_v13 = vsel %vm177_vm2, %v178_v11, %v176_v12 }
 0x16d   : > { %v180_v14 = vadd.f32 1e-06, %v179_v13 }
 0x16f   : > { %341 = vrcp.f32 %v180_v14 }
 0x179   : > { %v342_v15 = vpop.eup %341 }
 0x17a   : > { %v183_v17 = vmul.f32 %v342_v15, %v167_v4 }
 0x17c   : > { %v188_v19 = vmul.f32 %v287_v16, %v183_v17 }
 0x17e   : > { %v193_v20 = vadd.f32 %v288_v18, %v188_v19 }
 0x180   : > { %194 = vst.msk [vmem:[%s158_s5] sm:$0xff] %vm162_vm0, %v193_v20 }
 0x181   : > { %386 = shalt.err (!%p383_p4)
}
 0x182   : > { %s387_s24 = scalar_lea.hbm %s587_s14, 128  ;;  %s391_s27 = scalar_lea.hbm %s634_s2, 256 }
 0x183   : > { %p388_p5 = scmp.ne.s32.totalorder %s587_s14, %s387_s24  ;;  %p392_p0 = scmp.lt.u32.totalorder %s587_s14, %s634_s2 }
 0x184   : > { %p393_p1 = scmp.lt.u32.totalorder %s391_s27, %s387_s24  ;;  %p395_p6 = scmp.lt.u32.totalorder %s387_s24, %s587_s14 }
 0x185   : > { %p389_p8 = pnand %p388_p5, %p643_p11 }
 0x186   : > { %p394_p3 = por %p393_p1, %p392_p0 }
 0x187   : > { %p390_p9 = pneg %p389_p8 }
 0x188   : > { %p396_p12 = por %p395_p6, %p394_p3 }
 0x18a   : > { %p397_p13 = pnand %p396_p12, %p390_p9 }
 0x18c   : > { %400 = shalt.err (!%p397_p13)
}
 0x18d   : > { %295 = dma.vmem_to_hbm [thread:$0]  (%p643_p11), %s589_s6, 128, %s587_s14, %s196_s16  }
 0x18e PF: > { %s221_s28 = sand.u32 1, %s427_s9   ;;  %p644_p7 = scmp.ne.s32.totalorder %s639_s22, 0 }
 0x18f   : > { %p645_p10 = scmp.ge.s32.totalorder %s439_s12, 2  ;;  %s222_s30 = scalar_lea.sflag [#allocation4], %s221_s28 }
 0x191   : > { %p302_p2 = pnand %p645_p10, %p644_p7 }
 0x193   : > { %422 = dma.done.wait (!%p302_p2), %s222_s30, 128  }
 0x194   : > { %424 = vsyncadd (!%p302_p2), %s222_s30, 4294967168  ;;  %p15_p4 = scmp.ge.s32.totalorder %s483_s15, 4   ;;  %s646_s9 = smov %s431_s10 }
 0x195   : > { %s647_s10 = smov %s435_s11  ;;  %s648_s11 = smov %s495_s18 }
 0x196   : > { %s649_s12 = smov %s483_s15  ;;  %17 = sbr.rel (!%p15_p4) target bundleno = 5 (0x5), region = 73 }
 0x19d   :  { %227 = vsyncpa [#allocation3], 1 }
 0x19e   :  { %229 = vsyncpa [#allocation3 + $0x1], 1 }
 0x19f   :  { %230 = vsyncpa [#allocation4], 1 }
 0x1a0   :  { %232 = vsyncpa [#allocation4 + $0x1], 1 }

</bundles_post_ra>
